<compile_context>
chip_gen: v6e
topology: v6e:2x2x1
jax: 0.10.0
libtpu: 0.0.40
codegen_flags: <defaults>
</compile_context>

<pallas_src>
import jax
import jax.numpy as jnp
from jax.experimental import pallas as pl
from jax.experimental.pallas import tpu as pltpu


# ----------------------------------------------------------------------------
# Fused Pallas kernel: L GIN layers + JK='concat' predictor (one graph / step)
# ----------------------------------------------------------------------------
def ginepre_fused_kernel(a_ref, m_ref, e_ref, h0_ref,
                         w1_ref, b1_ref, w2_ref, b2_ref,
                         pw_ref, pb_ref, out_ref):
    num_layers, E, D = e_ref.shape
    N = h0_ref.shape[0]

    a = a_ref[...]                                           # (N, N) bf16
    m = m_ref[...]                                           # (N, E) bf16

    # Hoisted edge aggregation (independent of h): me[l] = M @ e_l, f32 acc.
    me = [jnp.dot(m, e_ref[l], preferred_element_type=jnp.float32)
          for l in range(num_layers)]                        # each (N, D) f32

    # Layer-0 features (only ever feed matmuls -> cast once to bf16).
    hb = h0_ref[...].astype(jnp.bfloat16)                    # (N, D) bf16
    # JK='concat' + Linear((L+1)*D, D_out) as a running sum of block matmuls.
    pred = jnp.dot(hb, pw_ref[0:D, :],
                   preferred_element_type=jnp.float32)       # (N, D_out) f32

    for l in range(num_layers):                              # statically unrolled
        # message passing: sum_{u->v}(h_u + e_uv) = A @ h + M @ e_l
        agg = jnp.dot(a, hb, preferred_element_type=jnp.float32) + me[l]

        # MLP: Linear(D, 2D) -> ReLU -> Linear(2D, D); BN folded into w2/b2.
        z = jnp.dot(agg.astype(jnp.bfloat16), w1_ref[l],
                    preferred_element_type=jnp.float32) + b1_ref[l]
        z = jnp.maximum(z, 0.0)
        y = jnp.dot(z.astype(jnp.bfloat16), w2_ref[l],
                    preferred_element_type=jnp.float32) + b2_ref[l]
        if l != num_layers - 1:          # ReLU on all GIN layers but the last
            y = jnp.maximum(y, 0.0)
        # Dropout(p=0.5): identity in eval mode.

        hb = y.astype(jnp.bfloat16)
        pred = pred + jnp.dot(hb, pw_ref[(l + 1) * D:(l + 2) * D, :],
                              preferred_element_type=jnp.float32)

    out_ref[...] = pred + pb_ref[...]


# ----------------------------------------------------------------------------
# Full GINEPRE forward over a batch of graphs
# (embedding gathers + BN fold in XLA; everything else in the fused kernel)
# ----------------------------------------------------------------------------
def ginepre_forward(params, A, M, x_cat, w_cat, bn_eps=1e-5):
    G, N, _ = A.shape
    E = M.shape[2]
    L, D, twoD = params["w1"].shape
    D_out = params["pred_w"].shape[1]

    # Node embeddings: sum of per-feature lookups -> (G, N, D) f32.
    h0 = None
    for i, tbl in enumerate(params["node_emb"]):
        emb = tbl[x_cat[..., i]]
        h0 = emb if h0 is None else h0 + emb

    # Edge embeddings for ALL layers at once: per categorical feature, gather
    # from the layer-stacked table (L, vocab_i, D) -> (G, L, E, D), then sum.
    e_all = None
    for i, tbl in enumerate(params["edge_emb"]):
        emb = jnp.take(tbl, w_cat[..., i], axis=1)           # (L, G, E, D)
        e_all = emb if e_all is None else e_all + emb
    e_all = jnp.moveaxis(e_all, 0, 1).astype(jnp.bfloat16)   # (G, L, E, D) bf16

    # bf16 MXU operands.  A/M entries are small integer edge multiplicities
    # (<= 256 for molecules) -> exact in bf16.
    A_bf = A.astype(jnp.bfloat16)
    M_bf = M.astype(jnp.bfloat16)

    # BatchNorm1d (eval) folded into w2/b2 from the running stats.
    s = params["bn_gamma"] * jax.lax.rsqrt(params["bn_var"] + bn_eps)  # (L,1,D)
    w2f = (params["w2"] * s).astype(jnp.bfloat16)                      # (L,2D,D)
    b2f = (params["b2"] - params["bn_mean"]) * s + params["bn_beta"]   # (L,1,D)
    w1_bf = params["w1"].astype(jnp.bfloat16)
    pw_bf = params["pred_w"].astype(jnp.bfloat16)

    inputs = (A_bf, M_bf, e_all, h0,
              w1_bf, params["b1"], w2f, b2f, pw_bf, params["pred_b"])

    flops = G * (2 * L * N * E * D            # M @ e_l
                 + 2 * L * N * N * D          # A @ h
                 + 2 * L * N * D * twoD       # Linear(D, 2D)
                 + 2 * L * N * twoD * D       # Linear(2D, D)
                 + 2 * (L + 1) * N * D * D_out)  # JK-concat predictor
    bytes_accessed = (sum(int(v.size) * v.dtype.itemsize for v in inputs)
                      + G * N * D_out * 4)

    gmap3 = lambda g: (g, 0, 0)
    gmap4 = lambda g: (g, 0, 0, 0)

    return pl.pallas_call(
        ginepre_fused_kernel,
        out_shape=jax.ShapeDtypeStruct((G, N, D_out), jnp.float32),
        grid=(G,),
        in_specs=[
            pl.BlockSpec((None, N, N), gmap3),               # A       (per graph)
            pl.BlockSpec((None, N, E), gmap3),               # M       (per graph)
            pl.BlockSpec((None, L, E, D), gmap4),            # e_all   (per graph)
            pl.BlockSpec((None, N, D), gmap3),               # h0      (per graph)
            pl.BlockSpec((L, D, twoD), lambda g: (0, 0, 0)),      # w1   (resident)
            pl.BlockSpec((L, 1, twoD), lambda g: (0, 0, 0)),      # b1
            pl.BlockSpec((L, twoD, D), lambda g: (0, 0, 0)),      # w2 (BN-folded)
            pl.BlockSpec((L, 1, D), lambda g: (0, 0, 0)),         # b2 (BN-folded)
            pl.BlockSpec(((L + 1) * D, D_out), lambda g: (0, 0)),  # pred_w
            pl.BlockSpec((1, D_out), lambda g: (0, 0)),            # pred_b
        ],
        out_specs=pl.BlockSpec((None, N, D_out), gmap3),
        compiler_params=pltpu.CompilerParams(
            dimension_semantics=("parallel",),
            # Resident set here is ~1 MiB; 32 MiB is safe on v5e/v6e/v7x
            # (v7x has only 64 MiB physical VMEM).
            vmem_limit_bytes=32 * 1024 * 1024,
        ),
        cost_estimate=pl.CostEstimate(flops=flops, transcendentals=0,
                                      bytes_accessed=bytes_accessed),
    )(*inputs)


# ----------------------------------------------------------------------------
# Deterministic parameter initialization (layer params stacked along axis 0)
# ----------------------------------------------------------------------------
def xavier_uniform(key, shape):
    fan_in, fan_out = shape[0], shape[1]
    bound = jnp.sqrt(6.0 / (fan_in + fan_out))
    return jax.random.uniform(key, shape, jnp.float32, -bound, bound)


def init_params(key, num_node_emb_list, num_edge_emb_list, num_layers, emb_dim):
    D, L = emb_dim, num_layers
    keys = jax.random.split(key, 2 + L)

    nkeys = jax.random.split(keys[0], len(num_node_emb_list))
    node_emb = [xavier_uniform(nkeys[i], (n, D))
                for i, n in enumerate(num_node_emb_list)]

    w1_l, w2_l = [], []
    edge_per_feat = [[] for _ in num_edge_emb_list]
    for l in range(L):
        lkeys = jax.random.split(keys[2 + l], 2 + len(num_edge_emb_list))
        w1_l.append(xavier_uniform(lkeys[0], (D, 2 * D)))
        w2_l.append(xavier_uniform(lkeys[1], (2 * D, D)))
        for i, n in enumerate(num_edge_emb_list):
            edge_per_feat[i].append(xavier_uniform(lkeys[2 + i], (n, D)))

    return {
        "node_emb": node_emb,
        # Per categorical edge feature: (L, vocab_i, D) stacked tables.
        "edge_emb": [jnp.stack(tbls) for tbls in edge_per_feat],
        "w1": jnp.stack(w1_l),                              # (L, D, 2D)
        "b1": jnp.zeros((L, 1, 2 * D), jnp.float32),
        "w2": jnp.stack(w2_l),                              # (L, 2D, D)
        "b2": jnp.zeros((L, 1, D), jnp.float32),
        # BatchNorm1d running stats / affine (freshly-initialized, eval mode).
        "bn_gamma": jnp.ones((L, 1, D), jnp.float32),
        "bn_beta": jnp.zeros((L, 1, D), jnp.float32),
        "bn_mean": jnp.zeros((L, 1, D), jnp.float32),
        "bn_var": jnp.ones((L, 1, D), jnp.float32),
        "pred_w": xavier_uniform(keys[1], ((L + 1) * D, D)),  # n_tasks = emb_dim
        "pred_b": jnp.zeros((1, D), jnp.float32),
    }


# ----------------------------------------------------------------------------
# Main
# ----------------------------------------------------------------------------
if __name__ == "__main__":
    key = jax.random.PRNGKey(0)

    # Small synthetic batched problem.
    G = 4                       # graphs per kernel call (parallel grid axis)
    N, E = 16, 24               # nodes, directed edges per graph
    emb_dim = 128               # D (lane-dense)
    num_layers = 3
    num_node_emb_list = [7, 4]  # two categorical node features
    num_edge_emb_list = [5, 3]  # two categorical edge features

    k_graph, k_x, k_w, k_params = jax.random.split(key, 4)

    # Graphs: random directed edges u -> v, as dense per-graph operators.
    gkeys = jax.random.split(k_graph, G)
    A_list, M_list = [], []
    for g in range(G):
        ks, kd = jax.random.split(gkeys[g])
        src = jax.random.randint(ks, (E,), 0, N, jnp.int32)
        dst = jax.random.randint(kd, (E,), 0, N, jnp.int32)
        A_list.append(jnp.zeros((N, N), jnp.float32).at[dst, src].add(1.0))
        M_list.append(jnp.zeros((N, E), jnp.float32)
                      .at[dst, jnp.arange(E)].set(1.0))
    A = jnp.stack(A_list)                                   # (G, N, N)
    M = jnp.stack(M_list)                                   # (G, N, E)

    # Categorical features (the `x`, `w` of GINEPRE.forward), batched.
    xk = jax.random.split(k_x, len(num_node_emb_list))
    x = jnp.stack([jax.random.randint(xk[i], (G, N), 0, n, jnp.int32)
                   for i, n in enumerate(num_node_emb_list)], axis=-1)  # (G,N,2)
    wk = jax.random.split(k_w, len(num_edge_emb_list))
    w = jnp.stack([jax.random.randint(wk[i], (G, E), 0, n, jnp.int32)
                   for i, n in enumerate(num_edge_emb_list)], axis=-1)  # (G,E,2)

    params = init_params(k_params, num_node_emb_list, num_edge_emb_list,
                         num_layers, emb_dim)

    fwd = jax.jit(ginepre_forward)
    out = jax.block_until_ready(fwd(params, A, M, x, w))

    assert out.shape == (G, N, emb_dim), out.shape
    assert out.dtype == jnp.float32
    print("KERNEL_OK")
</pallas_src>

<mosaic_0001>
module attributes {stable_mosaic.version = 11 : i64} {
  func.func @ginepre_fused_kernel(%arg0: i32, %arg1: memref<1x16x16xbf16, #tpu.memory_space<vmem>>, %arg2: memref<1x16x24xbf16, #tpu.memory_space<vmem>>, %arg3: memref<1x3x24x128xbf16, #tpu.memory_space<vmem>>, %arg4: memref<1x16x128xf32, #tpu.memory_space<vmem>>, %arg5: memref<3x128x256xbf16, #tpu.memory_space<vmem>>, %arg6: memref<3x1x256xf32, #tpu.memory_space<vmem>>, %arg7: memref<3x256x128xbf16, #tpu.memory_space<vmem>>, %arg8: memref<3x1x128xf32, #tpu.memory_space<vmem>>, %arg9: memref<512x128xbf16, #tpu.memory_space<vmem>>, %arg10: memref<1x128xf32, #tpu.memory_space<vmem>>, %arg11: memref<1x16x128xf32, #tpu.memory_space<vmem>>) attributes {dimension_semantics = [#tpu.dimension_semantics<parallel>], iteration_bounds = array<i64: 4>, scalar_prefetch = 0 : i64, scratch_operands = 0 : i64, tpu.core_type = #tpu.core_type<tc>, window_params = [{transform_indices = @transform_0, window_bounds = array<i64: 1, 16, 16>}, {transform_indices = @transform_1, window_bounds = array<i64: 1, 16, 24>}, {transform_indices = @transform_2, window_bounds = array<i64: 1, 3, 24, 128>}, {transform_indices = @transform_3, window_bounds = array<i64: 1, 16, 128>}, {pipeline_mode = #tpu.pipeline_mode<synchronous>, transform_indices = @transform_4, window_bounds = array<i64: 3, 128, 256>}, {pipeline_mode = #tpu.pipeline_mode<synchronous>, transform_indices = @transform_5, window_bounds = array<i64: 3, 1, 256>}, {pipeline_mode = #tpu.pipeline_mode<synchronous>, transform_indices = @transform_6, window_bounds = array<i64: 3, 256, 128>}, {pipeline_mode = #tpu.pipeline_mode<synchronous>, transform_indices = @transform_7, window_bounds = array<i64: 3, 1, 128>}, {pipeline_mode = #tpu.pipeline_mode<synchronous>, transform_indices = @transform_8, window_bounds = array<i64: 512, 128>}, {pipeline_mode = #tpu.pipeline_mode<synchronous>, transform_indices = @transform_9, window_bounds = array<i64: 1, 128>}, {transform_indices = @transform_10, window_bounds = array<i64: 1, 16, 128>}]} {
    %c0 = arith.constant 0 : index
    %c0_0 = arith.constant 0 : index
    %c0_1 = arith.constant 0 : index
    %0 = vector.load %arg1[%c0, %c0_0, %c0_1] : memref<1x16x16xbf16, #tpu.memory_space<vmem>>, vector<1x16x16xbf16>
    %1 = vector.shape_cast %0 : vector<1x16x16xbf16> to vector<16x16xbf16>
    %c0_2 = arith.constant 0 : index
    %c0_3 = arith.constant 0 : index
    %c0_4 = arith.constant 0 : index
    %2 = vector.load %arg2[%c0_2, %c0_3, %c0_4] : memref<1x16x24xbf16, #tpu.memory_space<vmem>>, vector<1x16x24xbf16>
    %3 = vector.shape_cast %2 : vector<1x16x24xbf16> to vector<16x24xbf16>
    %c0_5 = arith.constant 0 : index
    %c0_6 = arith.constant 0 : index
    %c0_7 = arith.constant 0 : index
    %c0_8 = arith.constant 0 : index
    %4 = vector.load %arg3[%c0_5, %c0_6, %c0_7, %c0_8] : memref<1x3x24x128xbf16, #tpu.memory_space<vmem>>, vector<1x1x24x128xbf16>
    %5 = vector.shape_cast %4 : vector<1x1x24x128xbf16> to vector<24x128xbf16>
    %cst = arith.constant dense<0.000000e+00> : vector<16x128xf32>
    %6 = tpu.matmul %3, %5, %cst {dimension_numbers = #tpu.dot_dimension_numbers<[1], [0], [0], [1], [0, 0, 1, 1], [], []>} : vector<16x24xbf16>, vector<24x128xbf16>, vector<16x128xf32> -> vector<16x128xf32>
    %c0_9 = arith.constant 0 : index
    %c1 = arith.constant 1 : index
    %c0_10 = arith.constant 0 : index
    %c0_11 = arith.constant 0 : index
    %7 = vector.load %arg3[%c0_9, %c1, %c0_10, %c0_11] : memref<1x3x24x128xbf16, #tpu.memory_space<vmem>>, vector<1x1x24x128xbf16>
    %8 = vector.shape_cast %7 : vector<1x1x24x128xbf16> to vector<24x128xbf16>
    %cst_12 = arith.constant dense<0.000000e+00> : vector<16x128xf32>
    %9 = tpu.matmul %3, %8, %cst_12 {dimension_numbers = #tpu.dot_dimension_numbers<[1], [0], [0], [1], [0, 0, 1, 1], [], []>} : vector<16x24xbf16>, vector<24x128xbf16>, vector<16x128xf32> -> vector<16x128xf32>
    %c0_13 = arith.constant 0 : index
    %c2 = arith.constant 2 : index
    %c0_14 = arith.constant 0 : index
    %c0_15 = arith.constant 0 : index
    %10 = vector.load %arg3[%c0_13, %c2, %c0_14, %c0_15] : memref<1x3x24x128xbf16, #tpu.memory_space<vmem>>, vector<1x1x24x128xbf16>
    %11 = vector.shape_cast %10 : vector<1x1x24x128xbf16> to vector<24x128xbf16>
    %cst_16 = arith.constant dense<0.000000e+00> : vector<16x128xf32>
    %12 = tpu.matmul %3, %11, %cst_16 {dimension_numbers = #tpu.dot_dimension_numbers<[1], [0], [0], [1], [0, 0, 1, 1], [], []>} : vector<16x24xbf16>, vector<24x128xbf16>, vector<16x128xf32> -> vector<16x128xf32>
    %c0_17 = arith.constant 0 : index
    %c0_18 = arith.constant 0 : index
    %c0_19 = arith.constant 0 : index
    %13 = vector.load %arg4[%c0_17, %c0_18, %c0_19] : memref<1x16x128xf32, #tpu.memory_space<vmem>>, vector<1x16x128xf32>
    %14 = vector.shape_cast %13 : vector<1x16x128xf32> to vector<16x128xf32>
    %15 = arith.truncf %14 : vector<16x128xf32> to vector<16x128xbf16>
    %c0_20 = arith.constant 0 : index
    %c0_21 = arith.constant 0 : index
    %16 = vector.load %arg9[%c0_20, %c0_21] : memref<512x128xbf16, #tpu.memory_space<vmem>>, vector<128x128xbf16>
    %cst_22 = arith.constant dense<0.000000e+00> : vector<16x128xf32>
    %17 = tpu.matmul %15, %16, %cst_22 {dimension_numbers = #tpu.dot_dimension_numbers<[1], [0], [0], [1], [0, 0, 1, 1], [], []>} : vector<16x128xbf16>, vector<128x128xbf16>, vector<16x128xf32> -> vector<16x128xf32>
    %cst_23 = arith.constant dense<0.000000e+00> : vector<16x128xf32>
    %18 = tpu.matmul %1, %15, %cst_23 {dimension_numbers = #tpu.dot_dimension_numbers<[1], [0], [0], [1], [0, 0, 1, 1], [], []>} : vector<16x16xbf16>, vector<16x128xbf16>, vector<16x128xf32> -> vector<16x128xf32>
    %19 = arith.addf %18, %6 : vector<16x128xf32>
    %20 = arith.truncf %19 : vector<16x128xf32> to vector<16x128xbf16>
    %c0_24 = arith.constant 0 : index
    %c0_25 = arith.constant 0 : index
    %c0_26 = arith.constant 0 : index
    %21 = vector.load %arg5[%c0_24, %c0_25, %c0_26] : memref<3x128x256xbf16, #tpu.memory_space<vmem>>, vector<1x128x256xbf16>
    %22 = vector.shape_cast %21 : vector<1x128x256xbf16> to vector<128x256xbf16>
    %cst_27 = arith.constant dense<0.000000e+00> : vector<16x256xf32>
    %23 = tpu.matmul %20, %22, %cst_27 {dimension_numbers = #tpu.dot_dimension_numbers<[1], [0], [0], [1], [0, 0, 1, 1], [], []>} : vector<16x128xbf16>, vector<128x256xbf16>, vector<16x256xf32> -> vector<16x256xf32>
    %c0_28 = arith.constant 0 : index
    %c0_29 = arith.constant 0 : index
    %c0_30 = arith.constant 0 : index
    %24 = vector.load %arg6[%c0_28, %c0_29, %c0_30] : memref<3x1x256xf32, #tpu.memory_space<vmem>>, vector<1x1x256xf32>
    %25 = vector.shape_cast %24 : vector<1x1x256xf32> to vector<1x256xf32>
    %26 = vector.broadcast %25 : vector<1x256xf32> to vector<16x256xf32>
    %27 = arith.addf %23, %26 : vector<16x256xf32>
    %cst_31 = arith.constant 0.000000e+00 : f32
    %28 = vector.broadcast %cst_31 : f32 to vector<16x256xf32>
    %29 = arith.maximumf %27, %28 : vector<16x256xf32>
    %30 = arith.truncf %29 : vector<16x256xf32> to vector<16x256xbf16>
    %c0_32 = arith.constant 0 : index
    %c0_33 = arith.constant 0 : index
    %c0_34 = arith.constant 0 : index
    %31 = vector.load %arg7[%c0_32, %c0_33, %c0_34] : memref<3x256x128xbf16, #tpu.memory_space<vmem>>, vector<1x256x128xbf16>
    %32 = vector.shape_cast %31 : vector<1x256x128xbf16> to vector<256x128xbf16>
    %cst_35 = arith.constant dense<0.000000e+00> : vector<16x128xf32>
    %33 = tpu.matmul %30, %32, %cst_35 {dimension_numbers = #tpu.dot_dimension_numbers<[1], [0], [0], [1], [0, 0, 1, 1], [], []>} : vector<16x256xbf16>, vector<256x128xbf16>, vector<16x128xf32> -> vector<16x128xf32>
    %c0_36 = arith.constant 0 : index
    %c0_37 = arith.constant 0 : index
    %c0_38 = arith.constant 0 : index
    %34 = vector.load %arg8[%c0_36, %c0_37, %c0_38] : memref<3x1x128xf32, #tpu.memory_space<vmem>>, vector<1x1x128xf32>
    %35 = vector.shape_cast %34 : vector<1x1x128xf32> to vector<1x128xf32>
    %36 = vector.broadcast %35 : vector<1x128xf32> to vector<16x128xf32>
    %37 = arith.addf %33, %36 : vector<16x128xf32>
    %cst_39 = arith.constant 0.000000e+00 : f32
    %38 = vector.broadcast %cst_39 : f32 to vector<16x128xf32>
    %39 = arith.maximumf %37, %38 : vector<16x128xf32>
    %40 = arith.truncf %39 : vector<16x128xf32> to vector<16x128xbf16>
    %c128 = arith.constant 128 : index
    %c0_40 = arith.constant 0 : index
    %41 = vector.load %arg9[%c128, %c0_40] : memref<512x128xbf16, #tpu.memory_space<vmem>>, vector<128x128xbf16>
    %cst_41 = arith.constant dense<0.000000e+00> : vector<16x128xf32>
    %42 = tpu.matmul %40, %41, %cst_41 {dimension_numbers = #tpu.dot_dimension_numbers<[1], [0], [0], [1], [0, 0, 1, 1], [], []>} : vector<16x128xbf16>, vector<128x128xbf16>, vector<16x128xf32> -> vector<16x128xf32>
    %43 = arith.addf %17, %42 : vector<16x128xf32>
    %cst_42 = arith.constant dense<0.000000e+00> : vector<16x128xf32>
    %44 = tpu.matmul %1, %40, %cst_42 {dimension_numbers = #tpu.dot_dimension_numbers<[1], [0], [0], [1], [0, 0, 1, 1], [], []>} : vector<16x16xbf16>, vector<16x128xbf16>, vector<16x128xf32> -> vector<16x128xf32>
    %45 = arith.addf %44, %9 : vector<16x128xf32>
    %46 = arith.truncf %45 : vector<16x128xf32> to vector<16x128xbf16>
    %c1_43 = arith.constant 1 : index
    %c0_44 = arith.constant 0 : index
    %c0_45 = arith.constant 0 : index
    %47 = vector.load %arg5[%c1_43, %c0_44, %c0_45] : memref<3x128x256xbf16, #tpu.memory_space<vmem>>, vector<1x128x256xbf16>
    %48 = vector.shape_cast %47 : vector<1x128x256xbf16> to vector<128x256xbf16>
    %cst_46 = arith.constant dense<0.000000e+00> : vector<16x256xf32>
    %49 = tpu.matmul %46, %48, %cst_46 {dimension_numbers = #tpu.dot_dimension_numbers<[1], [0], [0], [1], [0, 0, 1, 1], [], []>} : vector<16x128xbf16>, vector<128x256xbf16>, vector<16x256xf32> -> vector<16x256xf32>
    %c1_47 = arith.constant 1 : index
    %c0_48 = arith.constant 0 : index
    %c0_49 = arith.constant 0 : index
    %50 = vector.load %arg6[%c1_47, %c0_48, %c0_49] : memref<3x1x256xf32, #tpu.memory_space<vmem>>, vector<1x1x256xf32>
    %51 = vector.shape_cast %50 : vector<1x1x256xf32> to vector<1x256xf32>
    %52 = vector.broadcast %51 : vector<1x256xf32> to vector<16x256xf32>
    %53 = arith.addf %49, %52 : vector<16x256xf32>
    %cst_50 = arith.constant 0.000000e+00 : f32
    %54 = vector.broadcast %cst_50 : f32 to vector<16x256xf32>
    %55 = arith.maximumf %53, %54 : vector<16x256xf32>
    %56 = arith.truncf %55 : vector<16x256xf32> to vector<16x256xbf16>
    %c1_51 = arith.constant 1 : index
    %c0_52 = arith.constant 0 : index
    %c0_53 = arith.constant 0 : index
    %57 = vector.load %arg7[%c1_51, %c0_52, %c0_53] : memref<3x256x128xbf16, #tpu.memory_space<vmem>>, vector<1x256x128xbf16>
    %58 = vector.shape_cast %57 : vector<1x256x128xbf16> to vector<256x128xbf16>
    %cst_54 = arith.constant dense<0.000000e+00> : vector<16x128xf32>
    %59 = tpu.matmul %56, %58, %cst_54 {dimension_numbers = #tpu.dot_dimension_numbers<[1], [0], [0], [1], [0, 0, 1, 1], [], []>} : vector<16x256xbf16>, vector<256x128xbf16>, vector<16x128xf32> -> vector<16x128xf32>
    %c1_55 = arith.constant 1 : index
    %c0_56 = arith.constant 0 : index
    %c0_57 = arith.constant 0 : index
    %60 = vector.load %arg8[%c1_55, %c0_56, %c0_57] : memref<3x1x128xf32, #tpu.memory_space<vmem>>, vector<1x1x128xf32>
    %61 = vector.shape_cast %60 : vector<1x1x128xf32> to vector<1x128xf32>
    %62 = vector.broadcast %61 : vector<1x128xf32> to vector<16x128xf32>
    %63 = arith.addf %59, %62 : vector<16x128xf32>
    %cst_58 = arith.constant 0.000000e+00 : f32
    %64 = vector.broadcast %cst_58 : f32 to vector<16x128xf32>
    %65 = arith.maximumf %63, %64 : vector<16x128xf32>
    %66 = arith.truncf %65 : vector<16x128xf32> to vector<16x128xbf16>
    %c256 = arith.constant 256 : index
    %c0_59 = arith.constant 0 : index
    %67 = vector.load %arg9[%c256, %c0_59] : memref<512x128xbf16, #tpu.memory_space<vmem>>, vector<128x128xbf16>
    %cst_60 = arith.constant dense<0.000000e+00> : vector<16x128xf32>
    %68 = tpu.matmul %66, %67, %cst_60 {dimension_numbers = #tpu.dot_dimension_numbers<[1], [0], [0], [1], [0, 0, 1, 1], [], []>} : vector<16x128xbf16>, vector<128x128xbf16>, vector<16x128xf32> -> vector<16x128xf32>
    %69 = arith.addf %43, %68 : vector<16x128xf32>
    %cst_61 = arith.constant dense<0.000000e+00> : vector<16x128xf32>
    %70 = tpu.matmul %1, %66, %cst_61 {dimension_numbers = #tpu.dot_dimension_numbers<[1], [0], [0], [1], [0, 0, 1, 1], [], []>} : vector<16x16xbf16>, vector<16x128xbf16>, vector<16x128xf32> -> vector<16x128xf32>
    %71 = arith.addf %70, %12 : vector<16x128xf32>
    %72 = arith.truncf %71 : vector<16x128xf32> to vector<16x128xbf16>
    %c2_62 = arith.constant 2 : index
    %c0_63 = arith.constant 0 : index
    %c0_64 = arith.constant 0 : index
    %73 = vector.load %arg5[%c2_62, %c0_63, %c0_64] : memref<3x128x256xbf16, #tpu.memory_space<vmem>>, vector<1x128x256xbf16>
    %74 = vector.shape_cast %73 : vector<1x128x256xbf16> to vector<128x256xbf16>
    %cst_65 = arith.constant dense<0.000000e+00> : vector<16x256xf32>
    %75 = tpu.matmul %72, %74, %cst_65 {dimension_numbers = #tpu.dot_dimension_numbers<[1], [0], [0], [1], [0, 0, 1, 1], [], []>} : vector<16x128xbf16>, vector<128x256xbf16>, vector<16x256xf32> -> vector<16x256xf32>
    %c2_66 = arith.constant 2 : index
    %c0_67 = arith.constant 0 : index
    %c0_68 = arith.constant 0 : index
    %76 = vector.load %arg6[%c2_66, %c0_67, %c0_68] : memref<3x1x256xf32, #tpu.memory_space<vmem>>, vector<1x1x256xf32>
    %77 = vector.shape_cast %76 : vector<1x1x256xf32> to vector<1x256xf32>
    %78 = vector.broadcast %77 : vector<1x256xf32> to vector<16x256xf32>
    %79 = arith.addf %75, %78 : vector<16x256xf32>
    %cst_69 = arith.constant 0.000000e+00 : f32
    %80 = vector.broadcast %cst_69 : f32 to vector<16x256xf32>
    %81 = arith.maximumf %79, %80 : vector<16x256xf32>
    %82 = arith.truncf %81 : vector<16x256xf32> to vector<16x256xbf16>
    %c2_70 = arith.constant 2 : index
    %c0_71 = arith.constant 0 : index
    %c0_72 = arith.constant 0 : index
    %83 = vector.load %arg7[%c2_70, %c0_71, %c0_72] : memref<3x256x128xbf16, #tpu.memory_space<vmem>>, vector<1x256x128xbf16>
    %84 = vector.shape_cast %83 : vector<1x256x128xbf16> to vector<256x128xbf16>
    %cst_73 = arith.constant dense<0.000000e+00> : vector<16x128xf32>
    %85 = tpu.matmul %82, %84, %cst_73 {dimension_numbers = #tpu.dot_dimension_numbers<[1], [0], [0], [1], [0, 0, 1, 1], [], []>} : vector<16x256xbf16>, vector<256x128xbf16>, vector<16x128xf32> -> vector<16x128xf32>
    %c2_74 = arith.constant 2 : index
    %c0_75 = arith.constant 0 : index
    %c0_76 = arith.constant 0 : index
    %86 = vector.load %arg8[%c2_74, %c0_75, %c0_76] : memref<3x1x128xf32, #tpu.memory_space<vmem>>, vector<1x1x128xf32>
    %87 = vector.shape_cast %86 : vector<1x1x128xf32> to vector<1x128xf32>
    %88 = vector.broadcast %87 : vector<1x128xf32> to vector<16x128xf32>
    %89 = arith.addf %85, %88 : vector<16x128xf32>
    %90 = arith.truncf %89 : vector<16x128xf32> to vector<16x128xbf16>
    %c384 = arith.constant 384 : index
    %c0_77 = arith.constant 0 : index
    %91 = vector.load %arg9[%c384, %c0_77] : memref<512x128xbf16, #tpu.memory_space<vmem>>, vector<128x128xbf16>
    %cst_78 = arith.constant dense<0.000000e+00> : vector<16x128xf32>
    %92 = tpu.matmul %90, %91, %cst_78 {dimension_numbers = #tpu.dot_dimension_numbers<[1], [0], [0], [1], [0, 0, 1, 1], [], []>} : vector<16x128xbf16>, vector<128x128xbf16>, vector<16x128xf32> -> vector<16x128xf32>
    %93 = arith.addf %69, %92 : vector<16x128xf32>
    %c0_79 = arith.constant 0 : index
    %c0_80 = arith.constant 0 : index
    %94 = vector.load %arg10[%c0_79, %c0_80] : memref<1x128xf32, #tpu.memory_space<vmem>>, vector<1x128xf32>
    %95 = vector.broadcast %94 : vector<1x128xf32> to vector<16x128xf32>
    %96 = arith.addf %93, %95 : vector<16x128xf32>
    %c0_81 = arith.constant 0 : index
    %c0_82 = arith.constant 0 : index
    %c0_83 = arith.constant 0 : index
    %97 = vector.load %arg11[%c0_81, %c0_82, %c0_83] : memref<1x16x128xf32, #tpu.memory_space<vmem>>, vector<1x16x128xf32>
    %98 = vector.shape_cast %97 : vector<1x16x128xf32> to vector<16x128xf32>
    %99 = vector.shape_cast %96 : vector<16x128xf32> to vector<1x16x128xf32>
    tpu.vector_store %arg11[%c0_81, %c0_82, %c0_83], %99 {strides = array<i32>} : memref<1x16x128xf32, #tpu.memory_space<vmem>>, vector<1x16x128xf32>,
    return
  }
  func.func @transform_0(%arg0: i32) -> (i32, i32, i32) {
    %c0_i32 = arith.constant 0 : i32
    %c0_i32_0 = arith.constant 0 : i32
    %c0_i32_1 = arith.constant 0 : i32
    return %arg0, %c0_i32, %c0_i32_0 : i32, i32, i32
  }
  func.func @transform_1(%arg0: i32) -> (i32, i32, i32) {
    %c0_i32 = arith.constant 0 : i32
    %c0_i32_0 = arith.constant 0 : i32
    %c0_i32_1 = arith.constant 0 : i32
    return %arg0, %c0_i32, %c0_i32_0 : i32, i32, i32
  }
  func.func @transform_2(%arg0: i32) -> (i32, i32, i32, i32) {
    %c0_i32 = arith.constant 0 : i32
    %c0_i32_0 = arith.constant 0 : i32
    %c0_i32_1 = arith.constant 0 : i32
    %c0_i32_2 = arith.constant 0 : i32
    return %arg0, %c0_i32, %c0_i32_0, %c0_i32_1 : i32, i32, i32, i32
  }
  func.func @transform_3(%arg0: i32) -> (i32, i32, i32) {
    %c0_i32 = arith.constant 0 : i32
    %c0_i32_0 = arith.constant 0 : i32
    %c0_i32_1 = arith.constant 0 : i32
    return %arg0, %c0_i32, %c0_i32_0 : i32, i32, i32
  }
  func.func @transform_4(%arg0: i32) -> (i32, i32, i32) {
    %c0_i32 = arith.constant 0 : i32
    %c0_i32_0 = arith.constant 0 : i32
    %c0_i32_1 = arith.constant 0 : i32
    %c0_i32_2 = arith.constant 0 : i32
    return %c0_i32, %c0_i32_0, %c0_i32_1 : i32, i32, i32
  }
  func.func @transform_5(%arg0: i32) -> (i32, i32, i32) {
    %c0_i32 = arith.constant 0 : i32
    %c0_i32_0 = arith.constant 0 : i32
    %c0_i32_1 = arith.constant 0 : i32
    %c0_i32_2 = arith.constant 0 : i32
    return %c0_i32, %c0_i32_0, %c0_i32_1 : i32, i32, i32
  }
  func.func @transform_6(%arg0: i32) -> (i32, i32, i32) {
    %c0_i32 = arith.constant 0 : i32
    %c0_i32_0 = arith.constant 0 : i32
    %c0_i32_1 = arith.constant 0 : i32
    %c0_i32_2 = arith.constant 0 : i32
    return %c0_i32, %c0_i32_0, %c0_i32_1 : i32, i32, i32
  }
  func.func @transform_7(%arg0: i32) -> (i32, i32, i32) {
    %c0_i32 = arith.constant 0 : i32
    %c0_i32_0 = arith.constant 0 : i32
    %c0_i32_1 = arith.constant 0 : i32
    %c0_i32_2 = arith.constant 0 : i32
    return %c0_i32, %c0_i32_0, %c0_i32_1 : i32, i32, i32
  }
  func.func @transform_8(%arg0: i32) -> (i32, i32) {
    %c0_i32 = arith.constant 0 : i32
    %c0_i32_0 = arith.constant 0 : i32
    %c0_i32_1 = arith.constant 0 : i32
    return %c0_i32, %c0_i32_0 : i32, i32
  }
  func.func @transform_9(%arg0: i32) -> (i32, i32) {
    %c0_i32 = arith.constant 0 : i32
    %c0_i32_0 = arith.constant 0 : i32
    %c0_i32_1 = arith.constant 0 : i32
    return %c0_i32, %c0_i32_0 : i32, i32
  }
  func.func @transform_10(%arg0: i32) -> (i32, i32, i32) {
    %c0_i32 = arith.constant 0 : i32
    %c0_i32_0 = arith.constant 0 : i32
    %c0_i32_1 = arith.constant 0 : i32
    return %arg0, %c0_i32, %c0_i32_0 : i32, i32, i32
  }
}

</mosaic_0001>

<bundles_post_ra>
// kernel: ginepre_forward.1
= control target key start
LH: loop header
LB: loop body
LE: loop exit
PB: predicated region body
PF: predicated region fallthrough
CT: control target
= control target key end

     0   :  { %15 = vsyncpa [#allocation3], 0  ;;  %s3783_s0 = inlined_call_operand.vmem [shape: bf16[4,16,16], index: 0, kind: input, shape index: {}]   ;;  %s3784_s1 = inlined_call_operand.vmem [shape: bf16[4,16,24], index: 1, kind: input, shape index: {}]   ;;  %s3785_s2 = inlined_call_operand.vmem [shape: bf16[4,3,24,128], index: 2, kind: input, shape index: {}]   ;;  %s3786_s3 = inlined_call_operand.vmem [shape: f32[4,16,128], index: 3, kind: input, shape index: {}]   ;;  %s3787_s4 = inlined_call_operand.vmem [shape: bf16[3,128,256], index: 4, kind: input, shape index: {}]   ;;  %s3788_s5 = inlined_call_operand.vmem [shape: f32[3,1,256], index: 5, kind: input, shape index: {}]   ;;  %s3789_s6 = inlined_call_operand.vmem [shape: bf16[3,256,128], index: 6, kind: input, shape index: {}]   ;;  %s3790_s7 = inlined_call_operand.vmem [shape: f32[3,1,128], index: 7, kind: input, shape index: {}]   ;;  %s3791_s8 = inlined_call_operand.vmem [shape: bf16[512,128], index: 8, kind: input, shape index: {}]   ;;  %s3792_s9 = inlined_call_operand.vmem [shape: f32[1,128], index: 9, kind: input, shape index: {}]   ;;  %s3793_s10 = inlined_call_operand.hbm [shape: f32[4,16,128], index: 10, kind: output, shape index: {}]  }
   0x1   :  { %17 = vsyncpa [#allocation3 + $0x1], 0  ;;  %s3142_s13 = smov 0   ;;  %s3144_s14 = smov 0  }
   0x2   :  { %s3146_s15 = smov 0   ;;  %s3148_s16 = smov 0  }
   0x3 LB: > { %s3163_s17 = sadd.s32 4294967295, %s3079_s16   ;;  %s2302_s18 = sadd.s32 4294967294, %s3079_s16   ;;  %s3079_s16 = sphi %s3148_s16, %s3801_s16   ;;  %s3075_s15 = sphi %s3146_s15, %s3800_s15   ;;  %s3071_s14 = sphi %s3144_s14, %s3799_s14   ;;  %s3067_s13 = sphi %s3142_s13, %s3798_s13  }
   0x4   : > { %s3167_s19 = sadd.s32 1, %s3079_s16   ;;  %s260_s20 = sadd.s32 1, %s3075_s15 }
   0x5   : > { %s257_s21 = ssub.s32 %s3079_s16, %s3167_s19  ;;  %p270_p0 = scmp.ne.s32.totalorder %s3075_s15, %s3071_s14 }
   0x6   : > { %p258_p1 = scmp.eq.s32.totalorder %s257_s21, 0  ;;  %p271_p2 = scmp.eq.s32.totalorder %s3163_s17, 3 }
   0x7   : > { %p276_p3 = scmp.ne.s32.totalorder %s3071_s14, %s3067_s13  ;;  %p277_p4 = scmp.eq.s32.totalorder %s2302_s18, 3 }
   0x8   : > { %s3178_s22 = scalar_select %p258_p1, %s3075_s15, %s260_s20  }
   0x9   : > { %p3180_p5 = por %p271_p2, %p270_p0  ;;  %p3184_p6 = por %p277_p4, %p276_p3 }
   0xa   : > { %3794 = sst [smem:[#allocation5_spill]] %s3178_s22  ;;  %p2305_p7 = scmp.ge.s32.totalorder %s3079_s16, 1 }
   0xb   : > { %p345_p8 = scmp.lt.s32.totalorder %s3079_s16, 5 }
   0xd   : > { %p346_p9 = pnand %p2305_p7, %p345_p8 }
   0xe   : > { %p398_p10 = scmp.lt.s32.totalorder (!%p346_p9), %s3163_s17, 3  ;;  %s395_s20 = sand.u32 (!%p346_p9), 1, %s3071_s14  }
   0xf   : > { %349 = sbr.rel (%p346_p9) target bundleno = 2116 (0x844), region = 60  ;;  %s2306_s21 = sshll.u32 (!%p346_p9), %s395_s20, 4 }
  0x14   : > { %v3081_v0 = vmov 0.0   ;;  %vm3082_vm0 = vmmov 0   ;;  %s399_s25 = scalar_select %p398_p10, %s3163_s17, 3  ;;  %vm444_vm1 = vcmask 1043456   ;;  %vm440_vm2 = vcmask 195584   ;;  %v2891_v32 = vld [vmem:[%s3789_s6 + $0x78] sm:$0xff]  }
  0x15   : > { %2692 = vmatprep.subr.bf16.mxu1 %v3081_v0  ;;  %2696 = vmatprep.mubr.msk.bf16.mxu1 %vm3082_vm0, %v3081_v0  ;;  %v2869_v10 = vld [vmem:[%s3787_s4 + $0x74] ss:$8 sps:$4 sm:$0xff]   ;;  %v2867_v14 = vld [vmem:[%s3787_s4 + $0x70] ss:$8 sps:$4 sm:$0xff]   ;;  %v2872_v15 = vld [vmem:[%s3787_s4 + $0x64] ss:$8 sps:$4 sm:$0xff]  }
  0x16   : > { %2708 = vmatprep.subr.bf16.mxu0 %v3081_v0  ;;  %2712 = vmatprep.mubr.msk.bf16.mxu0 %vm3082_vm0, %v3081_v0  ;;  %s2814_s26 = smul.u32 36, %s399_s25  ;;  %s2571_s27 = sshll.u32 %s399_s25, 3  ;;  %v2870_v16 = vld [vmem:[%s3787_s4 + $0x60] ss:$8 sps:$4 sm:$0xff]   ;;  %vm627_vm3 = vcmask 130048   ;;  %v3083_v31 = vmov 0  }
  0x17   : > { %s3201_s30 = scalar_lea.vmem %s3783_s0, %s2571_s27  ;;  %s407_s18 = scalar_lea.vmem %s3784_s1, %s2571_s27  ;;  %v2875_v19 = vld [vmem:[%s3787_s4 + $0x54] ss:$8 sps:$4 sm:$0xff]   ;;  %v2873_v20 = vld [vmem:[%s3787_s4 + $0x50] ss:$8 sps:$4 sm:$0xff]   ;;  %v2878_v21 = vld [vmem:[%s3787_s4 + $0x44] ss:$8 sps:$4 sm:$0xff]  }
  0x18   : > { %s412_s22 = scalar_lea.vmem %s3785_s2, %s2814_s26  ;;  %v2861_v5 = vld [vmem:[%s407_s18] sm:$0xff]   ;;  %s2573_s28 = sshll.u32 %s399_s25, 4  ;;  %v2881_v23 = vld [vmem:[%s3787_s4 + $0x34] ss:$8 sps:$4 sm:$0xff]   ;;  %v2879_v24 = vld [vmem:[%s3787_s4 + $0x30] ss:$8 sps:$4 sm:$0xff]  }
  0x19   : > { %v2859_v1 = vld [vmem:[%s412_s22 + $0x8] ss:$0 sps:$4 sm:$0xff]   ;;  %v2860_v3 = vld [vmem:[%s412_s22] sm:$0xff]   ;;  %v2862_v4 = vld [vmem:[%s412_s22 + $0x14] ss:$0 sps:$4 sm:$0xff]   ;;  %s417_s26 = scalar_lea.vmem %s3786_s3, %s2573_s28  ;;  %s397_s27 = scalar_lea.vmem [#allocation2], %s2306_s21 }
  0x1a   : > { %v446_v2 = vsel %vm444_vm1, %v2859_v1, 0  ;;  %v2865_v6 = vld [vmem:[%s412_s22 + $0x20] ss:$0 sps:$4 sm:$0xff]   ;;  %v2866_v7 = vld [vmem:[%s412_s22 + $0x18] sm:$0xff]   ;;  %v503_v8 = vsel %vm444_vm1, %v2862_v4, 0  ;;  %v2863_v11 = vld [vmem:[%s412_s22 + $0xc] sm:$0xff]  }
  0x1b   : > { %2693 = vmatpush3.bf16.msra.mxu1 %v446_v2  ;;  %v560_v9 = vsel %vm444_vm1, %v2865_v6, 0  ;;  %v603_v12 = vld [vmem:[%s417_s26] sm:$0xff]  ;;  %v604_v13 = vld [vmem:[%s417_s26 + $0x8] sm:$0xff]  ;;  %v2887_v27 = vld [vmem:[%s3787_s4 + $0x14] ss:$8 sps:$4 sm:$0xff]   ;;  %s2204_s29 = sshll.u32 %s397_s27, 4  ;;  %s3736_s29 = int_to_ptr.vmem [resolvable:$true] %s2204_s29 }
  0x1c   : > { %2694 = vmatprep.subr.bf16.mxu1 %v3081_v0  ;;  %2709 = vmatpush3.bf16.msra.mxu0 %v560_v9  ;;  %v3234_v17 = vpack.c.bf16 %v604_v13, %v603_v12  ;;  %v3243_v18 = vld [vmem:[%s3201_s30] sm:$0xff]   ;;  %v2885_v28 = vld [vmem:[%s3787_s4 + $0x10] ss:$8 sps:$4 sm:$0xff]   ;;  %v2895_v36 = vld [vmem:[%s3789_s6 + $0x68] sm:$0xff]   ;;  %v691_v9 = vlaneseq  ;;  %s2574_s26 = sshll.u32 %s3163_s17, 8  ;;  %s3743_s30 = scalar_lea.sflag [#allocation3], %s395_s20 }
  0x1d   : > { %2710 = vmatprep.subr.bf16.mxu0 %v3081_v0  ;;  %v2876_v22 = vld [vmem:[%s3787_s4 + $0x40] ss:$8 sps:$4 sm:$0xff]   ;;  %v2884_v25 = vld [vmem:[%s3787_s4 + $0x24] ss:$8 sps:$4 sm:$0xff]   ;;  %v2892_v33 = vld [vmem:[%s3789_s6 + $0x38] sm:$0xff]   ;;  %s3741_s25 = scalar_lea.hbm %s3793_s10, %s2574_s26  ;;  %s3019_s18 = scalar_lea.vmem %s3736_s29, 256 }
  0x1e   : > { %v2882_v26 = vld [vmem:[%s3787_s4 + $0x20] ss:$8 sps:$4 sm:$0xff]   ;;  %v2890_v29 = vld [vmem:[%s3787_s4 + $0x4] ss:$8 sps:$4 sm:$0xff]   ;;  %v2893_v34 = vld [vmem:[%s3789_s6 + $0x70] sm:$0xff]   ;;  %p3020_p11 = scmp.ne.s32.totalorder %s3736_s29, %s3019_s18  ;;  %s3084_s17 = smov [#allocation2]  }
  0x1f   : > { %2695 = vmatpush3.bf16.msra.mxu1 %v2860_v3  ;;  %v2888_v30 = vld [vmem:[%s3787_s4] ss:$8 sps:$4 sm:$0xff]   ;;  %v2894_v35 = vld [vmem:[%s3789_s6 + $0x30] sm:$0xff]   ;;  %v2899_v40 = vld [vmem:[%s3789_s6 + $0x58] sm:$0xff]   ;;  %s3023_s21 = sshll.u32 %s3084_s17, 4  ;;  %s3024_s21 = int_to_ptr.vmem [resolvable:$false] %s3023_s21 }
  0x20   : > { %2700 = vmatprep.subr.bf16.mxu1 %v3081_v0  ;;  %2711 = vmatpush3.bf16.msra.mxu0 %v2866_v7  ;;  %v2896_v37 = vld [vmem:[%s3789_s6 + $0x28] sm:$0xff]   ;;  %v2897_v38 = vld [vmem:[%s3789_s6 + $0x60] sm:$0xff]   ;;  %v2900_v41 = vld [vmem:[%s3789_s6 + $0x18] sm:$0xff]   ;;  %p3021_p12 = pnand %p3020_p11, %p3180_p5  ;;  %s3025_s22 = scalar_lea.vmem %s3024_s21, 512 }
  0x21   : > { %781 = vmatprep.subr.bf16.mxu0 %v2869_v10  ;;  %v2898_v39 = vld [vmem:[%s3789_s6 + $0x20] sm:$0xff]   ;;  %v2901_v61 = vld [vmem:[%s3789_s6 + $0x50] sm:$0xff]   ;;  %v2903_v63 = vld [vmem:[%s3789_s6 + $0x48] sm:$0xff]   ;;  %v692_v10 = vshrl.u32 %v691_v9, 7  ;;  %p3026_p0 = scmp.lt.s32.totalorder %s3736_s29, %s3024_s21  ;;  %p3027_p1 = scmp.lt.s32.totalorder %s3025_s22, %s3019_s18 }
  0x22   : > { %2697 = vmatmul.mubr.msk.bf16.vlgmr.msra.gmra.mxu1 %vm440_vm2, %v2861_v5  ;;  %v2902_v62 = vld [vmem:[%s3789_s6 + $0x10] sm:$0xff]   ;;  %v2904_v1 = vld [vmem:[%s3789_s6 + $0x8] sm:$0xff]   ;;  %v2905_v2 = vld [vmem:[%s3789_s6 + $0x40] sm:$0xff]   ;;  %p3022_p13 = pneg %p3021_p12 }
  0x23   : > { %2701 = vmatpush3.bf16.msra.mxu1 %v503_v8  ;;  %2704 = vmatprep.mubr.msk.bf16.mxu1 %vm3082_vm0, %v3081_v0  ;;  %v2906_v3 = vld [vmem:[%s3789_s6] sm:$0xff]   ;;  %v2907_v4 = vld [vmem:[%s3791_s8 + $0x78] sm:$0xff]   ;;  %v2911_v6 = vld [vmem:[%s3791_s8 + $0x68] sm:$0xff]   ;;  %v3366_v12 = vsub.s32 0, %v692_v10  ;;  %p3028_p2 = por %p3027_p1, %p3026_p0 }
  0x24   : > { %2702 = vmatprep.subr.bf16.mxu1 %v3081_v0  ;;  %2713 = vmatmul.mubr.msk.bf16.vlgmr.msra.gmra.mxu0 %vm440_vm2, %v2861_v5  ;;  %v2913_v7 = vld [vmem:[%s3791_s8 + $0x60] sm:$0xff]   ;;  %v2915_v8 = vld [vmem:[%s3791_s8 + $0x58] sm:$0xff]  }
  0x25   : > { %782 = vmatpush1.bf16.msra.mxu0 %v2867_v14  ;;  %813 = vmatprep.mubr.bf16.mxu0 %v3083_v31  ;;  %v689_v13 = vld [vmem:[%s3788_s5] sm:$0x3]  ;;  %v2940_v9 = vld [vmem:[%s3787_s4 + $0xa4] ss:$8 sps:$4 sm:$0xff]   ;;  %p3029_p3 = pnand %p3028_p2, %p3022_p13 }
  0x26   : > { %783 = vmatprep.subr.bf16.mxu0 %v2872_v15 }
  0x27   : > { %2703 = vmatpush3.bf16.msra.mxu1 %v2863_v11  ;;  %v3364_v11 = vsub.s32 1, %v692_v10  ;;  %v2938_v10 = vld [vmem:[%s3787_s4 + $0xa0] ss:$8 sps:$4 sm:$0xff]  }
  0x28   : > { %2716 = vmatprep.subr.bf16.mxu1 %v3081_v0 }
  0x29   : > { %784 = vmatpush1.bf16.msra.mxu0 %v2870_v16  ;;  %v698_v15 = vrot.slane %v689_v13, %v3364_v11  ;;  %v694_v16 = vrot.slane %v689_v13, %v3366_v12 }
  0x2a   : > { %2705 = vmatmul.mubr.msk.bf16.vlgmr.msra.gmra.mxu1 %vm440_vm2, %v2861_v5  ;;  %785 = vmatprep.subr.bf16.mxu0 %v2875_v19  ;;  %v2909_v5 = vld [vmem:[%s3791_s8 + $0x70] sm:$0xff]  }
  0x2b   : > { %2717 = vmatpush3.bf16.msra.mxu1 %v3234_v17  ;;  %2718 = vmatprep.mubr.msk.bf16.mxu1 %vm3082_vm0, %v3081_v0 }
  0x2c   : > { %2586 = vmatprep.subr.bf16.mxu1 %v2891_v32  ;;  %v2908_v32 = vld [vmem:[%s3791_s8 + $0x38] sm:$0xff]  }
  0x2d   : > { %786 = vmatpush1.bf16.msra.mxu0 %v2873_v20 }
  0x2e   : > { %787 = vmatprep.subr.bf16.mxu0 %v2878_v21 }
  0x31   : > { %788 = vmatpush1.bf16.msra.mxu0 %v2876_v22 }
  0x32   : > { %2719 = vmatmul.mubr.msk.bf16.vlgmr.msra.gmra.mxu1 %vm627_vm3, %v3243_v18  ;;  %789 = vmatprep.subr.bf16.mxu0 %v2881_v23 }
  0x33   : > { %2587 = vmatpush3.bf16.msra.mxu1 %v2892_v33 }
  0x34   : > { %2588 = vmatprep.subr.bf16.mxu1 %v2893_v34  ;;  %v2910_v34 = vld [vmem:[%s3791_s8 + $0x30] sm:$0xff]  }
  0x35   : > { %790 = vmatpush1.bf16.msra.mxu0 %v2879_v24 }
  0x36   : > { %791 = vmatprep.subr.bf16.mxu0 %v2884_v25 }
  0x37   : > { %2589 = vmatpush3.bf16.msra.mxu1 %v2894_v35  ;;  %v2912_v35 = vld [vmem:[%s3791_s8 + $0x28] sm:$0xff]  }
  0x38   : > { %2590 = vmatprep.subr.bf16.mxu1 %v2895_v36  ;;  %v2914_v36 = vld [vmem:[%s3791_s8 + $0x20] sm:$0xff]  }
  0x39   : > { %792 = vmatpush1.bf16.msra.mxu0 %v2882_v26 }
  0x3a   : > { %793 = vmatprep.subr.bf16.mxu0 %v2887_v27 }
  0x3b   : > { %2591 = vmatpush3.bf16.msra.mxu1 %v2896_v37  ;;  %v2916_v37 = vld [vmem:[%s3791_s8 + $0x18] sm:$0xff]  }
  0x3c   : > { %2592 = vmatprep.subr.bf16.mxu1 %v2897_v38  ;;  %v2917_v38 = vld [vmem:[%s3791_s8 + $0x50] sm:$0xff]  }
  0x3d   : > { %794 = vmatpush1.bf16.msra.mxu0 %v2885_v28 }
  0x3e   : > { %795 = vmatprep.subr.bf16.mxu0 %v2890_v29 }
  0x3f   : > { %2593 = vmatpush3.bf16.msra.mxu1 %v2898_v39  ;;  %v2918_v39 = vld [vmem:[%s3791_s8 + $0x10] sm:$0xff]  }
  0x40   : > { %2594 = vmatprep.subr.bf16.mxu1 %v2899_v40  ;;  %v2919_v40 = vld [vmem:[%s3791_s8 + $0x48] sm:$0xff]  }
  0x41   : > { %796 = vmatpush1.bf16.msra.mxu0 %v2888_v30 }
  0x42   : > { %2722 = vmatprep.subr.bf16.mxu0 %v3081_v0 }
  0x43   : > { %2595 = vmatpush3.bf16.msra.mxu1 %v2900_v41  ;;  %v2920_v41 = vld [vmem:[%s3791_s8 + $0x8] sm:$0xff]  }
  0x44   : > { %2596 = vmatprep.subr.bf16.mxu1 %v2901_v61 }
  0x47   : > { %2597 = vmatpush3.bf16.msra.mxu1 %v2902_v62 }
  0x48   : > { %2598 = vmatprep.subr.bf16.mxu1 %v2903_v63 }
  0x4b   : > { %2599 = vmatpush3.bf16.msra.mxu1 %v2904_v1 }
  0x4c   : > { %2600 = vmatprep.subr.bf16.mxu1 %v2905_v2 }
  0x4f   : > { %2601 = vmatpush3.bf16.msra.mxu1 %v2906_v3 }
  0x50   : > { %2742 = vmatprep.subr.bf16.mxu1 %v3081_v0 }
  0xe2   : > { %v482_v42 = vpop.f32.mrf.mxu1 }
  0xe4   : > { %v2698_v43 = vpop.f32.mrf.mxu1  ;;  %v3315_v45 = vpop.f32.mrf.mxu0 }
  0xe5   : > { %v2922_v43 = vld [vmem:[%s3791_s8] sm:$0xff]  }
  0xe6   : > { %v485_v44 = vpop.f32.mrf.mxu1  ;;  %v2714_v47 = vpop.f32.mrf.mxu0 }
  0xe7   : > { %v2928_v47 = vld [vmem:[%s3787_s4 + $0xe4] ss:$8 sps:$4 sm:$0xff]  }
  0xe8   : > { %v2699_v46 = vpop.f32.mrf.mxu1  ;;  %v3319_v49 = vpop.f32.mrf.mxu0 }
  0xe9   : > { %v2925_v46 = vld [vmem:[%s3787_s4 + $0xf4] ss:$8 sps:$4 sm:$0xff]  }
  0xea   : > { %v3317_v48 = vpop.f32.mrf.mxu1  ;;  %v2715_v51 = vpop.f32.mrf.mxu0 }
  0xeb   : > { %v2929_v51 = vld [vmem:[%s3787_s4 + $0xd0] ss:$8 sps:$4 sm:$0xff]  }
  0xec   : > { %v2706_v50 = vpop.f32.mrf.mxu1 }
  0xed   : > { %v2931_v50 = vld [vmem:[%s3787_s4 + $0xd4] ss:$8 sps:$4 sm:$0xff]  }
  0xee   : > { %v3321_v52 = vpop.f32.mrf.mxu1 }
  0xf0   : > { %v2707_v53 = vpop.f32.mrf.mxu1 }
  0xf1   : > { %v2934_v53 = vld [vmem:[%s3787_s4 + $0xc4] ss:$8 sps:$4 sm:$0xff]  }
  0xf2   : > { %v665_v54 = vpop.f32.mrf.mxu1 }
  0xf3   : > { %v666_v57 = vadd.f32 %v665_v54, %v482_v42  ;;  %v2921_v42 = vld [vmem:[%s3791_s8 + $0x40] sm:$0xff]  }
  0xf4   : > { %v2720_v55 = vpop.f32.mrf.mxu1  ;;  %v2932_v54 = vld [vmem:[%s3787_s4 + $0xc0] ss:$8 sps:$4 sm:$0xff]  }
  0xf6   : > { %v668_v56 = vpop.f32.mrf.mxu1 }
  0xf7   : > { %v669_v58 = vadd.f32 %v668_v56, %v485_v44  ;;  %v2923_v44 = vld [vmem:[%s3787_s4 + $0xf0] ss:$8 sps:$4 sm:$0xff]  }
  0xf8   : > { %v2721_v59 = vpop.f32.mrf.mxu1 }
  0xf9   : > { %v672_v60 = vpack.c.bf16 %v669_v58, %v666_v57  ;;  %v2348_v58 = vld [vmem:[%s3790_s7] ss:$0 sm:$0xff] }
  0xfb   : > { %814 = vmatmul.mubr.bf16.vlgmr.msra.gmra.mxu0 %v672_v60 }
  0xfc   : > { %2738 = vmatprep.mubr.msk.bf16.mxu0 %vm3082_vm0, %v3081_v0  ;;  %2723 = vmatpush3.bf16.msra.mxu0 %v2907_v4 }
  0xfd   : > { %2724 = vmatprep.subr.bf16.mxu0 %v3081_v0 }
 0x100   : > { %2725 = vmatpush3.bf16.msra.mxu0 %v2909_v5  ;;  %v2937_v5 = vld [vmem:[%s3787_s4 + $0xb4] ss:$8 sps:$4 sm:$0xff]  }
 0x101   : > { %2726 = vmatprep.subr.bf16.mxu0 %v3081_v0 }
 0x104   : > { %2727 = vmatpush3.bf16.msra.mxu0 %v2911_v6  ;;  %v2935_v6 = vld [vmem:[%s3787_s4 + $0xb0] ss:$8 sps:$4 sm:$0xff]  }
 0x105   : > { %2728 = vmatprep.subr.bf16.mxu0 %v3081_v0 }
 0x108   : > { %2729 = vmatpush3.bf16.msra.mxu0 %v2913_v7 }
 0x109   : > { %2730 = vmatprep.subr.bf16.mxu0 %v3081_v0 }
 0x10c   : > { %2731 = vmatpush3.bf16.msra.mxu0 %v2915_v8 }
 0x10d   : > { %2732 = vmatprep.subr.bf16.mxu0 %v3081_v0 }
 0x110   : > { %2733 = vmatpush3.bf16.msra.mxu0 %v2917_v38 }
 0x111   : > { %2734 = vmatprep.subr.bf16.mxu0 %v3081_v0 }
 0x114   : > { %2735 = vmatpush3.bf16.msra.mxu0 %v2919_v40 }
 0x115   : > { %2736 = vmatprep.subr.bf16.mxu0 %v3081_v0 }
 0x118   : > { %2737 = vmatpush3.bf16.msra.mxu0 %v2921_v42  ;;  %v2957_v42 = vld [vmem:[%s3789_s6 + $0xd0] sm:$0xff]  }
 0x119   : > { %2762 = vmatprep.subr.bf16.mxu0 %v3081_v0 }
 0x1bb   : > { %v815_v14 = vpop.f32.mrf.mxu0 }
 0x1bc   : > { %v816_v23 = vadd.f32 %v815_v14, %v694_v16  ;;  %v2943_v14 = vld [vmem:[%s3787_s4 + $0x94] ss:$8 sps:$4 sm:$0xff]  }
 0x1bd   : > { %v817_v19 = vpop.f32.mrf.mxu0 }
 0x1be   : > { %v818_v21 = vadd.f32 %v817_v19, %v698_v15  ;;  %v824_v29 = vmax.f32 %v816_v23, 0.0  ;;  %v2944_v19 = vld [vmem:[%s3787_s4 + $0x80] ss:$8 sps:$4 sm:$0xff]   ;;  %v2950_v23 = vld [vmem:[%s3789_s6 + $0xb0] sm:$0xff]  }
 0x1bf   : > { %v819_v20 = vpop.f32.mrf.mxu0 }
 0x1c0   : > { %v820_v22 = vadd.f32 %v819_v20, %v694_v16  ;;  %v825_v27 = vmax.f32 %v818_v21, 0.0  ;;  %v2946_v16 = vld [vmem:[%s3787_s4 + $0x84] ss:$8 sps:$4 sm:$0xff]   ;;  %v2947_v20 = vld [vmem:[%s3789_s6 + $0xf8] sm:$0xff]  }
 0x1c1   : > { %v821_v24 = vpop.f32.mrf.mxu0  ;;  %v2948_v21 = vld [vmem:[%s3789_s6 + $0xb8] sm:$0xff]  }
 0x1c2   : > { %v822_v25 = vadd.f32 %v821_v24, %v698_v15  ;;  %v826_v26 = vmax.f32 %v820_v22, 0.0  ;;  %v2941_v15 = vld [vmem:[%s3787_s4 + $0x90] ss:$8 sps:$4 sm:$0xff]   ;;  %v2951_v24 = vld [vmem:[%s3789_s6 + $0xe8] sm:$0xff]  }
 0x1c3   : > { %v2949_v22 = vld [vmem:[%s3789_s6 + $0xf0] sm:$0xff]  }
 0x1c4   : > { %v827_v28 = vmax.f32 %v822_v25, 0.0  ;;  %v828_v33 = vpack.c.bf16 %v826_v26, %v824_v29  ;;  %v2952_v25 = vld [vmem:[%s3789_s6 + $0xa8] sm:$0xff]   ;;  %v2953_v26 = vld [vmem:[%s3789_s6 + $0xe0] sm:$0xff]   ;;  %v2956_v29 = vld [vmem:[%s3789_s6 + $0x98] sm:$0xff]  }
 0x1c6   : > { %v829_v30 = vpack.c.bf16 %v827_v28, %v825_v27  ;;  %v2954_v27 = vld [vmem:[%s3789_s6 + $0xa0] sm:$0xff]   ;;  %v2955_v28 = vld [vmem:[%s3789_s6 + $0xd8] sm:$0xff]  }
 0x1c8   : > { %997 = vmatprep.mubr.bf16.mxu1 %v829_v30 }
 0x1c9   : > { %998 = vmatmul.mubr.bf16.vlgmr.msra.gmra.mxu1 %v828_v33 }
 0x1ca   : > { %2743 = vmatpush3.bf16.msra.mxu1 %v2908_v32  ;;  %2758 = vmatprep.mubr.msk.bf16.mxu1 %vm3082_vm0, %v3081_v0 }
 0x1cb   : > { %2744 = vmatprep.subr.bf16.mxu1 %v3081_v0 }
 0x1ce   : > { %2745 = vmatpush3.bf16.msra.mxu1 %v2910_v34 }
 0x1cf   : > { %2746 = vmatprep.subr.bf16.mxu1 %v3081_v0 }
 0x1d2   : > { %2747 = vmatpush3.bf16.msra.mxu1 %v2912_v35 }
 0x1d3   : > { %2748 = vmatprep.subr.bf16.mxu1 %v3081_v0 }
 0x1d6   : > { %2749 = vmatpush3.bf16.msra.mxu1 %v2914_v36 }
 0x1d7   : > { %2750 = vmatprep.subr.bf16.mxu1 %v3081_v0 }
 0x1da   : > { %2751 = vmatpush3.bf16.msra.mxu1 %v2916_v37 }
 0x1db   : > { %2752 = vmatprep.subr.bf16.mxu1 %v3081_v0 }
 0x1de   : > { %2753 = vmatpush3.bf16.msra.mxu1 %v2918_v39 }
 0x1df   : > { %2754 = vmatprep.subr.bf16.mxu1 %v3081_v0 }
 0x1e2   : > { %2755 = vmatpush3.bf16.msra.mxu1 %v2920_v41 }
 0x1e3   : > { %2756 = vmatprep.subr.bf16.mxu1 %v3081_v0 }
 0x1e6   : > { %2757 = vmatpush3.bf16.msra.mxu1 %v2922_v43  ;;  %v2958_v43 = vld [vmem:[%s3789_s6 + $0x90] sm:$0xff]  }
 0x1e7   : > { %1355 = vmatprep.subr.bf16.mxu1 %v2925_v46  ;;  %v2962_v46 = vld [vmem:[%s3789_s6 + $0x80] sm:$0xff]  }
 0x1e9   : > { %2759 = vmatmul.mubr.bf16.vlgmr.msra.gmra.mxu1 %v3234_v17  ;;  %v2926_v17 = vld [vmem:[%s3787_s4 + $0xe0] ss:$8 sps:$4 sm:$0xff]  }
 0x1ea   : > { %1387 = vmatprep.mubr.bf16.mxu1 %v3083_v31  ;;  %1356 = vmatpush1.bf16.msra.mxu1 %v2923_v44  ;;  %v2961_v44 = vld [vmem:[%s3789_s6 + $0xc0] sm:$0xff]  }
 0x1eb   : > { %1357 = vmatprep.subr.bf16.mxu1 %v2928_v47  ;;  %v2963_v47 = vld [vmem:[%s3791_s8 + $0xb8] sm:$0xff]  }
 0x1ee   : > { %1358 = vmatpush1.bf16.msra.mxu1 %v2926_v17  ;;  %v2964_v17 = vld [vmem:[%s3791_s8 + $0xb0] sm:$0xff]  }
 0x1ef   : > { %1359 = vmatprep.subr.bf16.mxu1 %v2931_v50  ;;  %v2965_v50 = vld [vmem:[%s3791_s8 + $0xa8] sm:$0xff]  }
 0x1f2   : > { %1360 = vmatpush1.bf16.msra.mxu1 %v2929_v51  ;;  %v2966_v51 = vld [vmem:[%s3791_s8 + $0xa0] sm:$0xff]  }
 0x1f3   : > { %1361 = vmatprep.subr.bf16.mxu1 %v2934_v53  ;;  %v2398_v53 = vld [vmem:[%s3788_s5 + $0x2] sm:$0x3] }
 0x1f6   : > { %1362 = vmatpush1.bf16.msra.mxu1 %v2932_v54 }
 0x1f7   : > { %1363 = vmatprep.subr.bf16.mxu1 %v2937_v5 }
 0x1fa   : > { %1364 = vmatpush1.bf16.msra.mxu1 %v2935_v6 }
 0x1fb   : > { %1365 = vmatprep.subr.bf16.mxu1 %v2940_v9  ;;  %v2967_v9 = vld [vmem:[%s3791_s8 + $0x98] sm:$0xff]  }
 0x1fe   : > { %1366 = vmatpush1.bf16.msra.mxu1 %v2938_v10  ;;  %v2968_v10 = vld [vmem:[%s3791_s8 + $0x90] sm:$0xff]  }
 0x1ff   : > { %1367 = vmatprep.subr.bf16.mxu1 %v2943_v14  ;;  %v2970_v14 = vld [vmem:[%s3791_s8 + $0x80] sm:$0xff]  }
 0x202   : > { %1368 = vmatpush1.bf16.msra.mxu1 %v2941_v15 }
 0x203   : > { %1369 = vmatprep.subr.bf16.mxu1 %v2946_v16 }
 0x206   : > { %1370 = vmatpush1.bf16.msra.mxu1 %v2944_v19 }
 0x207   : > { %2768 = vmatprep.subr.bf16.mxu1 %v3081_v0 }
 0x289   : > { %v2602_v55 = vpop.f32.mrf.mxu1 }
 0x28b   : > { %v2603_v56 = vpop.f32.mrf.mxu1 }
 0x28c   : > { %v2604_v57 = vadd.f32 %v2603_v56, %v2602_v55  ;;  %v1272_v55 = vrot.slane %v2398_v53, %v3364_v11  ;;  %v1268_v56 = vrot.slane %v2398_v53, %v3366_v12  ;;  %v3001_v53 = vld [vmem:[%s3789_s6 + $0x160] sm:$0xff]  }
 0x28d   : > { %v2605_v59 = vpop.f32.mrf.mxu1 }
 0x28e   : > { %v1000_v61 = vadd.f32 %v2604_v57, %v2348_v58 }
 0x28f   : > { %v2606_v60 = vpop.f32.mrf.mxu1 }
 0x290   : > { %v2607_v62 = vadd.f32 %v2606_v60, %v2605_v59  ;;  %v1006_v1 = vmax.f32 %v1000_v61, 0.0 }
 0x292   : > { %v1003_v63 = vadd.f32 %v2607_v62, %v2348_v58 }
 0x294   : > { %v1007_v2 = vmax.f32 %v1003_v63, 0.0 }
 0x296   : > { %v1008_v3 = vpack.c.bf16 %v1007_v2, %v1006_v1 }
 0x298   : > { %2739 = vmatmul.mubr.bf16.vlgmr.msra.gmra.mxu0 %v1008_v3 }
 0x299   : > { %2763 = vmatpush3.bf16.msra.mxu0 %v1008_v3  ;;  %2764 = vmatprep.mubr.msk.bf16.mxu0 %vm3082_vm0, %v3081_v0 }
 0x29a   : > { %2628 = vmatprep.subr.bf16.mxu0 %v2947_v20  ;;  %v2448_v20 = vld [vmem:[%s3790_s7 + $0x1] ss:$0 sm:$0xff] }
 0x2a0   : > { %2765 = vmatmul.mubr.msk.bf16.vlgmr.msra.gmra.mxu0 %vm627_vm3, %v3243_v18 }
 0x2a1   : > { %2629 = vmatpush3.bf16.msra.mxu0 %v2948_v21 }
 0x2a2   : > { %2630 = vmatprep.subr.bf16.mxu0 %v2949_v22 }
 0x2a5   : > { %2631 = vmatpush3.bf16.msra.mxu0 %v2950_v23 }
 0x2a6   : > { %2632 = vmatprep.subr.bf16.mxu0 %v2951_v24 }
 0x2a9   : > { %v3451_v4 = vpop.f32.mrf.mxu1  ;;  %2633 = vmatpush3.bf16.msra.mxu0 %v2952_v25 }
 0x2aa   : > { %2634 = vmatprep.subr.bf16.mxu0 %v2953_v26 }
 0x2ab   : > { %v2760_v7 = vpop.f32.mrf.mxu1 }
 0x2ad   : > { %v3459_v8 = vpop.f32.mrf.mxu1  ;;  %2635 = vmatpush3.bf16.msra.mxu0 %v2954_v27 }
 0x2ae   : > { %2636 = vmatprep.subr.bf16.mxu0 %v2955_v28  ;;  %v2973_v28 = vld [vmem:[%s3787_s4 + $0x174] ss:$8 sps:$4 sm:$0xff]  }
 0x2af   : > { %v2761_v13 = vpop.f32.mrf.mxu1 }
 0x2b0   : > { %v2969_v13 = vld [vmem:[%s3791_s8 + $0x88] sm:$0xff]  }
 0x2b1   : > { %2637 = vmatpush3.bf16.msra.mxu0 %v2956_v29 }
 0x2b2   : > { %2638 = vmatprep.subr.bf16.mxu0 %v2957_v42  ;;  %v2991_v42 = vld [vmem:[%s3787_s4 + $0x114] ss:$8 sps:$4 sm:$0xff]  }
 0x2b5   : > { %2639 = vmatpush3.bf16.msra.mxu0 %v2958_v43  ;;  %v2989_v43 = vld [vmem:[%s3787_s4 + $0x110] ss:$8 sps:$4 sm:$0xff]  }
 0x358   : > { %v3510_v30 = vpop.f32.mrf.mxu0 }
 0x35a   : > { %v2740_v32 = vpop.f32.mrf.mxu0 }
 0x35b   : > { %v2971_v32 = vld [vmem:[%s3787_s4 + $0x170] ss:$8 sps:$4 sm:$0xff]  }
 0x35c   : > { %v3512_v33 = vpop.f32.mrf.mxu0 }
 0x35e   : > { %v2741_v34 = vpop.f32.mrf.mxu0 }
 0x35f   : > { %v2976_v34 = vld [vmem:[%s3787_s4 + $0x164] ss:$8 sps:$4 sm:$0xff]  }
 0x360   : > { %v1237_v35 = vpop.f32.mrf.mxu0 }
 0x361   : > { %v1238_v38 = vadd.f32 %v1237_v35, %v3317_v48  ;;  %v2959_v48 = vld [vmem:[%s3789_s6 + $0xc8] sm:$0xff]  }
 0x362   : > { %v2766_v36 = vpop.f32.mrf.mxu0  ;;  %2640 = vmatprep.subr.bf16.mxu0 %v2959_v48  ;;  %v2974_v35 = vld [vmem:[%s3787_s4 + $0x160] ss:$8 sps:$4 sm:$0xff]   ;;  %v2994_v48 = vld [vmem:[%s3787_s4 + $0x104] ss:$8 sps:$4 sm:$0xff]  }
 0x363   : > { %v2979_v36 = vld [vmem:[%s3787_s4 + $0x154] ss:$8 sps:$4 sm:$0xff]  }
 0x364   : > { %v1240_v37 = vpop.f32.mrf.mxu0 }
 0x365   : > { %v1241_v39 = vadd.f32 %v1240_v37, %v3321_v52  ;;  %v2960_v52 = vld [vmem:[%s3789_s6 + $0x88] sm:$0xff]   ;;  %v2977_v37 = vld [vmem:[%s3787_s4 + $0x150] ss:$8 sps:$4 sm:$0xff]  }
 0x366   : > { %v2767_v40 = vpop.f32.mrf.mxu0  ;;  %2641 = vmatpush3.bf16.msra.mxu0 %v2960_v52  ;;  %v2992_v52 = vld [vmem:[%s3787_s4 + $0x100] ss:$8 sps:$4 sm:$0xff]  }
 0x367   : > { %v1244_v41 = vpack.c.bf16 %v1241_v39, %v1238_v38  ;;  %2642 = vmatprep.subr.bf16.mxu0 %v2961_v44  ;;  %v2985_v38 = vld [vmem:[%s3787_s4 + $0x134] ss:$8 sps:$4 sm:$0xff]   ;;  %v2983_v39 = vld [vmem:[%s3787_s4 + $0x130] ss:$8 sps:$4 sm:$0xff]   ;;  %v2988_v40 = vld [vmem:[%s3787_s4 + $0x124] ss:$8 sps:$4 sm:$0xff]  }
 0x368   : > { %v2995_v44 = vld [vmem:[%s3789_s6 + $0x178] sm:$0xff]  }
 0x369   : > { %1388 = vmatmul.mubr.bf16.vlgmr.msra.gmra.mxu1 %v1244_v41  ;;  %v2986_v41 = vld [vmem:[%s3787_s4 + $0x120] ss:$8 sps:$4 sm:$0xff]  }
 0x36a   : > { %2784 = vmatprep.mubr.msk.bf16.mxu1 %vm3082_vm0, %v3081_v0  ;;  %2643 = vmatpush3.bf16.msra.mxu0 %v2962_v46  ;;  %v2996_v46 = vld [vmem:[%s3789_s6 + $0x138] sm:$0xff]  }
 0x36b   : > { %2788 = vmatprep.subr.bf16.mxu0 %v3081_v0  ;;  %2769 = vmatpush3.bf16.msra.mxu1 %v2963_v47  ;;  %v2997_v47 = vld [vmem:[%s3789_s6 + $0x170] sm:$0xff]  }
 0x36c   : > { %2770 = vmatprep.subr.bf16.mxu1 %v3081_v0 }
 0x36f   : > { %2771 = vmatpush3.bf16.msra.mxu1 %v2964_v17  ;;  %v2998_v17 = vld [vmem:[%s3789_s6 + $0x130] sm:$0xff]  }
 0x370   : > { %2772 = vmatprep.subr.bf16.mxu1 %v3081_v0 }
 0x373   : > { %2773 = vmatpush3.bf16.msra.mxu1 %v2965_v50  ;;  %v2999_v50 = vld [vmem:[%s3789_s6 + $0x168] sm:$0xff]  }
 0x374   : > { %2774 = vmatprep.subr.bf16.mxu1 %v3081_v0 }
 0x377   : > { %2775 = vmatpush3.bf16.msra.mxu1 %v2966_v51  ;;  %v3000_v51 = vld [vmem:[%s3789_s6 + $0x128] sm:$0xff]  }
 0x378   : > { %2776 = vmatprep.subr.bf16.mxu1 %v3081_v0 }
 0x37b   : > { %2777 = vmatpush3.bf16.msra.mxu1 %v2967_v9 }
 0x37c   : > { %2778 = vmatprep.subr.bf16.mxu1 %v3081_v0 }
 0x37f   : > { %2779 = vmatpush3.bf16.msra.mxu1 %v2968_v10  ;;  %v3010_v10 = vld [vmem:[%s3789_s6 + $0x100] sm:$0xff]  }
 0x380   : > { %2780 = vmatprep.subr.bf16.mxu1 %v3081_v0 }
 0x383   : > { %2781 = vmatpush3.bf16.msra.mxu1 %v2969_v13  ;;  %v3011_v13 = vld [vmem:[%s3791_s8 + $0xf8] sm:$0xff]  }
 0x384   : > { %2782 = vmatprep.subr.bf16.mxu1 %v3081_v0 }
 0x387   : > { %2783 = vmatpush3.bf16.msra.mxu1 %v2970_v14  ;;  %v3012_v14 = vld [vmem:[%s3791_s8 + $0xf0] sm:$0xff]  }
 0x388   : > { %2661 = vmatprep.subr.bf16.mxu1 %v2995_v44 }
 0x429   : > { %v1389_v54 = vpop.f32.mrf.mxu1 }
 0x42a   : > { %v1390_v61 = vadd.f32 %v1389_v54, %v1268_v56  ;;  %v3002_v54 = vld [vmem:[%s3789_s6 + $0x120] sm:$0xff]  }
 0x42b   : > { %v1391_v57 = vpop.f32.mrf.mxu1 }
 0x42c   : > { %v1392_v59 = vadd.f32 %v1391_v57, %v1272_v55  ;;  %v1398_v5 = vmax.f32 %v1390_v61, 0.0  ;;  %v1197_v57 = vadd.f32 %v3451_v4, %v3510_v30  ;;  %v1200_v61 = vadd.f32 %v3459_v8, %v3512_v33  ;;  %v3005_v8 = vld [vmem:[%s3789_s6 + $0x150] sm:$0xff]   ;;  %v3009_v33 = vld [vmem:[%s3789_s6 + $0x140] sm:$0xff]  }
 0x42d   : > { %v1393_v58 = vpop.f32.mrf.mxu1  ;;  %v3006_v30 = vld [vmem:[%s3789_s6 + $0x110] sm:$0xff]  }
 0x42e   : > { %v1394_v60 = vadd.f32 %v1393_v58, %v1268_v56  ;;  %v1399_v2 = vmax.f32 %v1392_v59, 0.0  ;;  %v3004_v56 = vld [vmem:[%s3789_s6 + $0x118] sm:$0xff]  }
 0x42f   : > { %v1395_v62 = vpop.f32.mrf.mxu1 }
 0x430   : > { %v1396_v63 = vadd.f32 %v1395_v62, %v1272_v55  ;;  %v1400_v1 = vmax.f32 %v1394_v60, 0.0  ;;  %v3003_v55 = vld [vmem:[%s3789_s6 + $0x158] sm:$0xff]  }
 0x432   : > { %v1401_v3 = vmax.f32 %v1396_v63, 0.0  ;;  %v1402_v7 = vpack.c.bf16 %v1400_v1, %v1398_v5 }
 0x434   : > { %v1403_v6 = vpack.c.bf16 %v1401_v3, %v1399_v2 }
 0x436   : > { %1573 = vmatprep.mubr.bf16.mxu0 %v1403_v6 }
 0x437   : > { %1574 = vmatmul.mubr.bf16.vlgmr.msra.gmra.mxu0 %v1402_v7 }
 0x438   : > { %2790 = vmatprep.mubr.msk.bf16.mxu0 %vm3082_vm0, %v3081_v0 }
 0x4f7   : > { %v2644_v15 = vpop.f32.mrf.mxu0 }
 0x4f9   : > { %v2645_v16 = vpop.f32.mrf.mxu0 }
 0x4fa   : > { %v2646_v19 = vadd.f32 %v2645_v16, %v2644_v15  ;;  %v3013_v15 = vld [vmem:[%s3791_s8 + $0xe8] sm:$0xff]   ;;  %v3014_v16 = vld [vmem:[%s3791_s8 + $0xe0] sm:$0xff]  }
 0x4fb   : > { %v2647_v21 = vpop.f32.mrf.mxu0 }
 0x4fc   : > { %v1576_v23 = vadd.f32 %v2646_v19, %v2448_v20  ;;  %v3015_v19 = vld [vmem:[%s3791_s8 + $0xd8] sm:$0xff]  }
 0x4fd   : > { %v2648_v22 = vpop.f32.mrf.mxu0 }
 0x4fe   : > { %v2649_v24 = vadd.f32 %v2648_v22, %v2647_v21  ;;  %v1582_v26 = vmax.f32 %v1576_v23, 0.0 }
 0x500   : > { %v1579_v25 = vadd.f32 %v2649_v24, %v2448_v20  ;;  %v2490_v20 = vld [vmem:[%s3788_s5 + $0x4] sm:$0x3] }
 0x501   : > { %v1761_v22 = vrot.slane %v2490_v20, %v3364_v11  ;;  %v1757_v23 = vrot.slane %v2490_v20, %v3366_v12  ;;  %v3016_v11 = vld [vmem:[%s3791_s8 + $0xd0] sm:$0xff]   ;;  %v3017_v12 = vld [vmem:[%s3791_s8 + $0xc8] sm:$0xff]  }
 0x502   : > { %v1583_v27 = vmax.f32 %v1579_v25, 0.0 }
 0x504   : > { %v1584_v29 = vpack.c.bf16 %v1583_v27, %v1582_v26 }
 0x506   : > { %2785 = vmatmul.mubr.bf16.vlgmr.msra.gmra.mxu1 %v1584_v29  ;;  %2789 = vmatpush3.bf16.msra.mxu0 %v1584_v29 }
 0x507   : > { %1844 = vmatprep.subr.bf16.mxu0 %v2973_v28  ;;  %2662 = vmatpush3.bf16.msra.mxu1 %v2996_v46 }
 0x508   : > { %2663 = vmatprep.subr.bf16.mxu1 %v2997_v47 }
 0x509   : > { %2791 = vmatmul.mubr.msk.bf16.vlgmr.msra.gmra.mxu0 %vm627_vm3, %v3243_v18  ;;  %v2982_v18 = vld [vmem:[%s3787_s4 + $0x144] ss:$8 sps:$4 sm:$0xff]  }
 0x50a   : > { %1845 = vmatpush1.bf16.msra.mxu0 %v2971_v32  ;;  %1876 = vmatprep.mubr.bf16.mxu0 %v3083_v31  ;;  %v2980_v31 = vld [vmem:[%s3787_s4 + $0x140] ss:$8 sps:$4 sm:$0xff]  }
 0x50b   : > { %1846 = vmatprep.subr.bf16.mxu0 %v2976_v34  ;;  %2664 = vmatpush3.bf16.msra.mxu1 %v2998_v17  ;;  %v2565_v17 = vld [vmem:[%s3792_s9] ss:$0 sm:$0xff] }
 0x50c   : > { %2665 = vmatprep.subr.bf16.mxu1 %v2999_v50 }
 0x50e   : > { %1847 = vmatpush1.bf16.msra.mxu0 %v2974_v35 }
 0x50f   : > { %1848 = vmatprep.subr.bf16.mxu0 %v2979_v36  ;;  %2666 = vmatpush3.bf16.msra.mxu1 %v3000_v51 }
 0x510   : > { %2667 = vmatprep.subr.bf16.mxu1 %v3001_v53 }
 0x512   : > { %1849 = vmatpush1.bf16.msra.mxu0 %v2977_v37 }
 0x513   : > { %1850 = vmatprep.subr.bf16.mxu0 %v2982_v18  ;;  %2668 = vmatpush3.bf16.msra.mxu1 %v3002_v54 }
 0x514   : > { %2669 = vmatprep.subr.bf16.mxu1 %v3003_v55 }
 0x516   : > { %1851 = vmatpush1.bf16.msra.mxu0 %v2980_v31 }
 0x517   : > { %1852 = vmatprep.subr.bf16.mxu0 %v2985_v38  ;;  %2670 = vmatpush3.bf16.msra.mxu1 %v3004_v56  ;;  %v3018_v38 = vld [vmem:[%s3791_s8 + $0xc0] sm:$0xff]  }
 0x518   : > { %2671 = vmatprep.subr.bf16.mxu1 %v3005_v8 }
 0x51a   : > { %1853 = vmatpush1.bf16.msra.mxu0 %v2983_v39 }
 0x51b   : > { %1854 = vmatprep.subr.bf16.mxu0 %v2988_v40  ;;  %2672 = vmatpush3.bf16.msra.mxu1 %v3006_v30 }
 0x51e   : > { %1855 = vmatpush1.bf16.msra.mxu0 %v2986_v41 }
 0x51f   : > { %1856 = vmatprep.subr.bf16.mxu0 %v2991_v42 }
 0x522   : > { %1857 = vmatpush1.bf16.msra.mxu0 %v2989_v43  ;;  %v2540_v43 = vld [vmem:[%s3790_s7 + $0x2] ss:$0 sm:$0xff] }
 0x523   : > { %1858 = vmatprep.subr.bf16.mxu0 %v2994_v48 }
 0x526   : > { %1859 = vmatpush1.bf16.msra.mxu0 %v2992_v52 }
 0x527   : > { %2794 = vmatprep.subr.bf16.mxu0 %v3081_v0 }
 0x5c6   : > { %v1683_v58 = vpop.f32.mrf.mxu1 }
 0x5c7   : > { %v3662_v59 = vadd.f32 %v1683_v58, %v1197_v57 }
 0x5c8   : > { %v2786_v60 = vpop.f32.mrf.mxu1 }
 0x5c9   : > { %v1726_v62 = vpop.f32.mrf.mxu0 }
 0x5ca   : > { %v1686_v63 = vpop.f32.mrf.mxu1  ;;  %v1727_v6 = vadd.f32 %v1726_v62, %v3315_v45  ;;  %v3007_v45 = vld [vmem:[%s3789_s6 + $0x148] sm:$0xff]  }
 0x5cb   : > { %v3666_v1 = vadd.f32 %v1686_v63, %v1200_v61  ;;  %v2792_v2 = vpop.f32.mrf.mxu0  ;;  %2673 = vmatprep.subr.bf16.mxu1 %v3007_v45 }
 0x5cc   : > { %v2787_v3 = vpop.f32.mrf.mxu1 }
 0x5cd   : > { %v1729_v5 = vpop.f32.mrf.mxu0 }
 0x5ce   : > { %v1730_v7 = vadd.f32 %v1729_v5, %v3319_v49  ;;  %v3008_v49 = vld [vmem:[%s3789_s6 + $0x108] sm:$0xff]  }
 0x5cf   : > { %v2793_v9 = vpop.f32.mrf.mxu0  ;;  %2674 = vmatpush3.bf16.msra.mxu1 %v3008_v49 }
 0x5d0   : > { %v1733_v4 = vpack.c.bf16 %v1730_v7, %v1727_v6  ;;  %2675 = vmatprep.subr.bf16.mxu1 %v3009_v33 }
 0x5d2   : > { %1877 = vmatmul.mubr.bf16.vlgmr.msra.gmra.mxu0 %v1733_v4 }
 0x5d3   : > { %2810 = vmatprep.mubr.msk.bf16.mxu0 %vm3082_vm0, %v3081_v0  ;;  %2676 = vmatpush3.bf16.msra.mxu1 %v3010_v10 }
 0x5d4   : > { %2795 = vmatpush3.bf16.msra.mxu0 %v3011_v13 }
 0x5d5   : > { %2796 = vmatprep.subr.bf16.mxu0 %v3081_v0 }
 0x5d8   : > { %2797 = vmatpush3.bf16.msra.mxu0 %v3012_v14 }
 0x5d9   : > { %2798 = vmatprep.subr.bf16.mxu0 %v3081_v0 }
 0x5dc   : > { %2799 = vmatpush3.bf16.msra.mxu0 %v3013_v15 }
 0x5dd   : > { %2800 = vmatprep.subr.bf16.mxu0 %v3081_v0 }
 0x5e0   : > { %2801 = vmatpush3.bf16.msra.mxu0 %v3014_v16 }
 0x5e1   : > { %2802 = vmatprep.subr.bf16.mxu0 %v3081_v0 }
 0x5e4   : > { %2803 = vmatpush3.bf16.msra.mxu0 %v3015_v19 }
 0x5e5   : > { %2804 = vmatprep.subr.bf16.mxu0 %v3081_v0 }
 0x5e8   : > { %2805 = vmatpush3.bf16.msra.mxu0 %v3016_v11 }
 0x5e9   : > { %2806 = vmatprep.subr.bf16.mxu0 %v3081_v0 }
 0x5ec   : > { %2807 = vmatpush3.bf16.msra.mxu0 %v3017_v12 }
 0x5ed   : > { %2808 = vmatprep.subr.bf16.mxu0 %v3081_v0 }
 0x5f0   : > { %2809 = vmatpush3.bf16.msra.mxu0 %v3018_v38 }
 0x692   : > { %v1878_v21 = vpop.f32.mrf.mxu0 }
 0x693   : > { %v1879_v28 = vadd.f32 %v1878_v21, %v1757_v23 }
 0x694   : > { %v1880_v24 = vpop.f32.mrf.mxu0 }
 0x695   : > { %v1881_v26 = vadd.f32 %v1880_v24, %v1761_v22  ;;  %v1887_v37 = vmax.f32 %v1879_v28, 0.0 }
 0x696   : > { %v1882_v25 = vpop.f32.mrf.mxu0 }
 0x697   : > { %v1883_v27 = vadd.f32 %v1882_v25, %v1757_v23  ;;  %v1888_v35 = vmax.f32 %v1881_v26, 0.0 }
 0x698   : > { %v1884_v29 = vpop.f32.mrf.mxu0 }
 0x699   : > { %v1885_v32 = vadd.f32 %v1884_v29, %v1761_v22  ;;  %v1889_v34 = vmax.f32 %v1883_v27, 0.0 }
 0x69b   : > { %v1890_v36 = vmax.f32 %v1885_v32, 0.0  ;;  %v1891_v31 = vpack.c.bf16 %v1889_v34, %v1887_v37 }
 0x69d   : > { %v1892_v18 = vpack.c.bf16 %v1890_v36, %v1888_v35 }
 0x69f   : > { %2062 = vmatprep.mubr.bf16.mxu1 %v1892_v18 }
 0x6a0   : > { %2063 = vmatmul.mubr.bf16.vlgmr.msra.gmra.mxu1 %v1891_v31 }
 0x760   : > { %v2677_v39 = vpop.f32.mrf.mxu1 }
 0x762   : > { %v2678_v40 = vpop.f32.mrf.mxu1 }
 0x763   : > { %v2679_v42 = vadd.f32 %v2678_v40, %v2677_v39 }
 0x764   : > { %v2680_v41 = vpop.f32.mrf.mxu1 }
 0x765   : > { %v2065_v44 = vadd.f32 %v2679_v42, %v2540_v43 }
 0x766   : > { %v2681_v48 = vpop.f32.mrf.mxu1 }
 0x767   : > { %v2682_v52 = vadd.f32 %v2681_v48, %v2680_v41 }
 0x769   : > { %v2068_v46 = vadd.f32 %v2682_v52, %v2540_v43 }
 0x76b   : > { %v2071_v47 = vpack.c.bf16 %v2068_v46, %v2065_v44 }
 0x76d   : > { %2811 = vmatmul.mubr.bf16.vlgmr.msra.gmra.mxu0 %v2071_v47 }
 0x82d   : > { %v2170_v0 = vpop.f32.mrf.mxu0 }
 0x82e   : > { %v2177_v50 = vadd.f32 %v2170_v0, %v3662_v59 }
 0x82f   : > { %v2812_v51 = vpop.f32.mrf.mxu0 }
 0x830   : > { %v2186_v53 = vadd.f32 %v2565_v17, %v2177_v50 }
 0x831   : > { %v2173_v54 = vpop.f32.mrf.mxu0 }
 0x832   : > { %2188 = vst [vmem:[%s397_s27] sm:$0xff] %v2186_v53  ;;  %v2178_v55 = vadd.f32 %v2173_v54, %v3666_v1 }
 0x833   : > { %v2813_v56 = vpop.f32.mrf.mxu0 }
 0x834   : > { %v2187_v57 = vadd.f32 %v2565_v17, %v2178_v55 }
 0x836   : > { %2189 = vst [vmem:[%s397_s27 + $0x8] sm:$0xff] %v2187_v57 }
 0x837   : > { %3032 = shalt.err (!%p3029_p3)
}
 0x838   : > { %s3033_s20 = scalar_lea.hbm %s3741_s25, 256  ;;  %s3037_s26 = scalar_lea.hbm %s3793_s10, 1024 }
 0x839   : > { %p3034_p4 = scmp.ne.s32.totalorder %s3741_s25, %s3033_s20  ;;  %p3038_p9 = scmp.lt.s32.totalorder %s3741_s25, %s3793_s10 }
 0x83a   : > { %p3039_p10 = scmp.lt.s32.totalorder %s3037_s26, %s3033_s20 }
 0x83b   : > { %p3035_p7 = pnand %p3034_p4, %p3180_p5 }
 0x83c   : > { %p3040_p11 = por %p3039_p10, %p3038_p9 }
 0x83d   : > { %p3036_p8 = pneg %p3035_p7 }
 0x83f   : > { %p3041_p12 = pnand %p3040_p11, %p3036_p8 }
 0x841   : > { %3044 = shalt.err (!%p3041_p12)
}
 0x842   : > { %s3085_s18 = smov 128   ;;  %s3086_s17 = smov 8  }
 0x843   : > { %2815 = dma.vmem_to_hbm [thread:$0]  (%p3180_p5), %s3736_s29, 256, %s3741_s25, %s3743_s30, %s3085_s18, %s3085_s18, %s3086_s17  }
 0x844 PF: > { %p2821_p13 = scmp.ge.s32.totalorder %s3079_s16, 2  ;;  %s2219_s21 = sand.u32 1, %s3067_s13  }
 0x845   : > { %s2220_s22 = scalar_lea.sflag [#allocation3], %s2219_s21 }
 0x846   : > { %p2818_p0 = pnand %p2821_p13, %p3184_p6 }
 0x848   : > { %p2819_p1 = pneg %p2818_p0 }
 0x84a   : > { %3062 = dma.done.wait (%p2819_p1), %s2220_s22, 256  }
 0x84b   : > { %3064 = vsyncadd (%p2819_p1), %s2220_s22, 4294967040  ;;  %s3797_s20 = sld [smem:[#allocation5_spill]]  ;;  %p20_p2 = scmp.ge.s32.totalorder %s3167_s19, 6  }
 0x84c   : > { %s3798_s13 = smov %s3071_s14  ;;  %s3799_s14 = smov %s3075_s15 }
 0x84d   : > { %s3801_s16 = smov %s3167_s19  ;;  %22 = sbr.rel (!%p20_p2) target bundleno = 3 (0x3), region = 114 }
 0x851   : > { %s3800_s15 = smov %s3797_s20 }
 0x852   :  { %2225 = vsyncpa [#allocation3], 1 }
 0x853   :  { %2227 = vsyncpa [#allocation3 + $0x1], 1 }

</bundles_post_ra>
